<compile_context>
chip_gen: v7x
topology: tpu7x:2x2x1
jax: 0.10.0
libtpu: 0.0.40
codegen_flags: <defaults>
</compile_context>

<pallas_src>
import jax
import jax.numpy as jnp
from jax import lax
from jax.experimental import pallas as pl
from jax.experimental.pallas import tpu as pltpu

_INV_SQRT2 = 0.7071067811865476

# f32 erf rational approximation (XLA's f32 erf coefficients) so the GELU matches
# torch.nn.GELU() (exact, erf-based) to ~1e-7 in f32.
_ERF_ALPHA = (0.00022905065861350646, 0.0034082910107109506, 0.050955695062380861,
              0.18520832239976145, 1.128379143519084)
_ERF_BETA = (-1.1791602954361697e-07, 2.3547966471313185e-05, 0.0010179625278914885,
             0.014070470171167667, 0.11098505178285362, 0.49746925110067538, 1.0)


def _erf_f32(x):
    # Kernel-internal only (uses pl.reciprocal).  The rational fit is valid on [-4, 4];
    # keep the clip (erf saturates to +-1 beyond it, the clip costs 2 VPU ops).
    x = jnp.clip(x, -4.0, 4.0)
    x2 = x * x
    p = _ERF_ALPHA[0]
    for c in _ERF_ALPHA[1:]:
        p = p * x2 + c
    q = _ERF_BETA[0]
    for c in _ERF_BETA[1:]:
        q = q * x2 + c
    # EUP-seeded reciprocal + one Newton-Raphson step: the divide leaves the VPU slot
    # (EUP co-issues), and the refinement squares the seed error so full f32 accuracy is
    # kept (approx=True alone could push the 1e-4 GELU tolerance).
    r = pl.reciprocal(q, approx=True)
    r = r * (2.0 - q * r)
    return x * p * r


def _gelu_exact(x):
    return 0.5 * x * (1.0 + _erf_f32(x * _INV_SQRT2))


def _make_resblock_kernel(H, W, C, KH, KW, NB, matmul_dtype=jnp.float32):
    PH, PW = KH // 2, KW // 2
    HW = H * W

    def kernel(x_ref, w1_ref, b1_ref, w2_ref, b2_ref, o_ref):
        # Lane position within an image row (0..W-1).  Only the W (column) wrap needs a
        # fix-up; per-image flat rolls of a*W handle the H wrap exactly.
        w_pos = lax.broadcasted_iota(jnp.int32, (C, HW), 1) % W

        def col_variant(x, b):
            """out[c, h, w] = x[c, h, (w + b) % W]  (circular column shift by b)."""
            if b == 0:
                return x
            main = pltpu.roll(x, shift=(-b) % HW, axis=1)
            if b > 0:
                fix = pltpu.roll(x, shift=(W - b) % HW, axis=1)
                mask = w_pos >= (W - b)
            else:
                fix = pltpu.roll(x, shift=(-b - W) % HW, axis=1)
                mask = w_pos < (-b)
            return jnp.where(mask, fix, main)

        def conv_circular(x, w_flat, bias):
            # Column variants (dw axis), wrap-fixed once, stacked along the contraction
            # (sublane) axis -> (KW*C, HW).
            cols = [col_variant(x, b) for b in range(-PW, PW + 1)]
            s_cols = cols[0] if len(cols) == 1 else jnp.concatenate(cols, axis=0)
            # Row variants (dh axis) are pure per-image flat rolls of a*W (never need a
            # fix-up).  Rolling the stacked block shifts every row independently, so one
            # roll covers all KW column variants at once.  Final stack is tap-major
            # (dh, dw, cin) -> matches the (C, KH*KW*C) weight layout.
            rows = [s_cols if a == 0
                    else pltpu.roll(s_cols, shift=(-a * W) % HW, axis=1)
                    for a in range(-PH, PH + 1)]
            s = rows[0] if len(rows) == 1 else jnp.concatenate(rows, axis=0)
            # Single MXU matmul per conv (K = KH*KW*C), f32 accumulation.
            # TODO(synk): at production C, hold w_flat in the MXU across images with
            # pltpu.matmul_push_rhs/acc_lhs/pop if the vex slot still binds.
            acc = jnp.dot(w_flat.astype(matmul_dtype), s.astype(matmul_dtype),
                          preferred_element_type=jnp.float32)
            return acc + bias                      # bias (C, 1) broadcast over lanes

        w1 = w1_ref[...]
        b1 = b1_ref[...]
        w2 = w2_ref[...]
        b2 = b2_ref[...]

        # Per-image loop (fori): bounds the live range of the per-image temporaries
        # (column variants / stacked taps), so pressure does not grow with NB.
        @pl.loop(0, NB)
        def _(i):
            x = x_ref[i]                                           # (C, HW) f32
            h = _gelu_exact(conv_circular(x, w1, b1))              # conv1 + GELU
            y = conv_circular(h, w2, b2) + x                       # conv2 + residual
            o_ref[i] = _gelu_exact(y).astype(o_ref.dtype)          # final GELU

    return kernel


def _tpu_vmem_capacity_bytes():
    try:
        return int(pltpu.get_tpu_info().vmem_capacity_bytes)
    except Exception:
        return 64 << 20            # conservative fallback: v7x per-TensorCore VMEM


def _step_vmem_bytes(nb, C, HW, taps):
    """Estimated VMEM footprint of one grid step (double-buffered in/out blocks,
    per-image in-kernel temporaries, both convs' weights)."""
    img = C * HW * 4
    tmp = (2 * taps + 8) * img                  # per-image temporaries (bounded by pl.loop)
    weights = 2 * (C * taps * C + C) * 4        # both convs' tap matrices + biases
    return 4 * nb * img + tmp + 2 * weights


def _pick_batch_block(N, C, HW, taps):
    """Largest divisor of N whose grid step fits half of physical VMEM.

    Generation aware: v7x (64 MiB VMEM, 2 TensorCores) keeps >= 2 grid steps so the
    'parallel' batch axis feeds both cores; v5e/v6e (128 MiB, 1 TensorCore) simply
    maximise NB -- extra grid steps there are pure ~0.35us/step overhead."""
    vmem_cap = _tpu_vmem_capacity_bytes()
    multi_tc = vmem_cap <= (64 << 20)           # v7x heuristic (per-core VMEM)
    budget = vmem_cap // 2
    fitting = [d for d in range(1, N + 1)
               if N % d == 0 and _step_vmem_bytes(d, C, HW, taps) <= budget]
    if not fitting:
        return 1
    if multi_tc and N >= 2:
        two_step = [d for d in fitting if N // d >= 2]
        return max(two_step) if two_step else max(fitting)
    return max(fitting)


def _vmem_limit_bytes(nb, C, HW, taps):
    """Explicit scoped-VMEM limit sized from the actual buffers (avoids v5e's 16 MiB /
    v6e's 32 MiB default caps and stays inside v7x's 64 MiB physical VMEM)."""
    vmem_cap = _tpu_vmem_capacity_bytes()
    need = _step_vmem_bytes(nb, C, HW, taps)
    return int(min(vmem_cap * 3 // 4, max(2 * need, 32 << 20)))


def resblock_forward(x_nchw, w1, b1, w2, b2, *, batch_block=None,
                     matmul_dtype=jnp.float32):
    """ResBlock forward. x_nchw: (N, C, H, W) f32; conv weights in PyTorch OIHW layout."""
    N, C, H, W = x_nchw.shape
    Cout, Cin, KH, KW = w1.shape
    assert Cout == C and Cin == C and KH % 2 == 1 and KW % 2 == 1
    assert H > KH // 2 and W > KW // 2
    HW = H * W
    TAPS = KH * KW
    # Full lane-density (unmasked vst, cheap rolls) wants H*W to be a multiple of 128
    # (true for 16x16); other shapes stay correct but use masked lanes.
    # TODO(synk): pad H*W up to a lane multiple for odd spatial shapes.

    # NCHW -> (N, C, H*W): pure reshape of contiguous trailing dims (no transpose, no
    # extra HBM pass).  This is also the lane-dense channel-major kernel layout.
    x_flat = x_nchw.reshape(N, C, HW).astype(jnp.float32)

    def to_tap_matrix(w):
        # OIHW -> (Cout, KH*KW*Cin), tap-major (dh, dw, cin): lane-dense weight layout
        # matching the stacked-activation contraction axis in the kernel.
        return jnp.transpose(w, (0, 2, 3, 1)).reshape(C, TAPS * C).astype(jnp.float32)

    NB = _pick_batch_block(N, C, HW, TAPS) if batch_block is None else batch_block
    assert N % NB == 0
    vmem_limit = _vmem_limit_bytes(NB, C, HW, TAPS)

    kernel = _make_resblock_kernel(H, W, C, KH, KW, NB, matmul_dtype)

    out_flat = pl.pallas_call(
        kernel,
        out_shape=jax.ShapeDtypeStruct((N, C, HW), jnp.float32),
        grid_spec=pltpu.PrefetchScalarGridSpec(
            num_scalar_prefetch=0,
            grid=(N // NB,),
            in_specs=[
                pl.BlockSpec((NB, C, HW), lambda n: (n, 0, 0)),
                # Constant operands: single-buffered (no pointless double buffer) and
                # lane-dense (C, KH*KW*C) / (C, 1).
                pl.BlockSpec((C, TAPS * C), lambda n: (0, 0),
                             pipeline_mode=pl.Buffered(1)),
                pl.BlockSpec((C, 1), lambda n: (0, 0),
                             pipeline_mode=pl.Buffered(1)),
                pl.BlockSpec((C, TAPS * C), lambda n: (0, 0),
                             pipeline_mode=pl.Buffered(1)),
                pl.BlockSpec((C, 1), lambda n: (0, 0),
                             pipeline_mode=pl.Buffered(1)),
            ],
            out_specs=pl.BlockSpec((NB, C, HW), lambda n: (n, 0, 0)),
        ),
        compiler_params=pltpu.CompilerParams(
            dimension_semantics=("parallel",),      # batch axis -> both v7x TensorCores
            vmem_limit_bytes=vmem_limit,
        ),
    )(x_flat, to_tap_matrix(w1), b1.reshape(C, 1).astype(jnp.float32),
      to_tap_matrix(w2), b2.reshape(C, 1).astype(jnp.float32))

    return out_flat.reshape(N, C, H, W)


def _reference(x, w1, b1, w2, b2):
    """Pure-JAX reference mirroring the PyTorch module (NCHW, circular 'same' conv)."""
    def conv(z, w, b):
        kh, kw = w.shape[2] // 2, w.shape[3] // 2
        zp = jnp.pad(z, ((0, 0), (0, 0), (kh, kh), (kw, kw)), mode="wrap")
        y = lax.conv_general_dilated(
            zp, w, window_strides=(1, 1), padding="VALID",
            dimension_numbers=("NCHW", "OIHW", "NCHW"))
        return y + b[None, :, None, None]

    def gelu(z):
        return 0.5 * z * (1.0 + lax.erf(z * _INV_SQRT2))

    h = gelu(conv(x, w1, b1))
    h = conv(h, w2, b2) + x
    return gelu(h)


if __name__ == "__main__":
    N, C, H, W = 2, 4, 16, 16
    KH, KW = 3, 3

    key = jax.random.PRNGKey(0)
    k0, k1, k2, k3, k4 = jax.random.split(key, 5)
    bound = 1.0 / float(C * KH * KW) ** 0.5  # PyTorch Conv2d default init range
    x = jax.random.normal(k0, (N, C, H, W), dtype=jnp.float32)
    w1 = jax.random.uniform(k1, (C, C, KH, KW), jnp.float32, -bound, bound)
    b1 = jax.random.uniform(k2, (C,), jnp.float32, -bound, bound)
    w2 = jax.random.uniform(k3, (C, C, KH, KW), jnp.float32, -bound, bound)
    b2 = jax.random.uniform(k4, (C,), jnp.float32, -bound, bound)

    out = jax.block_until_ready(jax.jit(resblock_forward)(x, w1, b1, w2, b2))

    ref = _reference(x, w1, b1, w2, b2)
    assert out.shape == x.shape and out.dtype == jnp.float32
    max_err = float(jnp.max(jnp.abs(out - ref)))
    if max_err > 1e-4:
        raise AssertionError(f"Pallas ResBlock mismatch vs reference: max abs err = {max_err}")

    print("KERNEL_OK")
</pallas_src>

<mosaic_0001>
module attributes {stable_mosaic.version = 11 : i64} {
  func.func @kernel(%arg0: i32, %arg1: memref<1x4x256xf32, #tpu.memory_space<vmem>>, %arg2: memref<4x36xf32, #tpu.memory_space<vmem>>, %arg3: memref<4x1xf32, #tpu.memory_space<vmem>>, %arg4: memref<4x36xf32, #tpu.memory_space<vmem>>, %arg5: memref<4x1xf32, #tpu.memory_space<vmem>>, %arg6: memref<1x4x256xf32, #tpu.memory_space<vmem>>) attributes {dimension_semantics = [#tpu.dimension_semantics<parallel>], iteration_bounds = array<i64: 2>, scalar_prefetch = 0 : i64, scratch_operands = 0 : i64, tpu.core_type = #tpu.core_type<tc>, window_params = [{transform_indices = @transform_0, window_bounds = array<i64: 1, 4, 256>}, {pipeline_mode = #tpu.pipeline_mode<synchronous>, transform_indices = @transform_1, window_bounds = array<i64: 4, 36>}, {pipeline_mode = #tpu.pipeline_mode<synchronous>, transform_indices = @transform_2, window_bounds = array<i64: 4, 1>}, {pipeline_mode = #tpu.pipeline_mode<synchronous>, transform_indices = @transform_3, window_bounds = array<i64: 4, 36>}, {pipeline_mode = #tpu.pipeline_mode<synchronous>, transform_indices = @transform_4, window_bounds = array<i64: 4, 1>}, {transform_indices = @transform_5, window_bounds = array<i64: 1, 4, 256>}]} {
    %0 = tpu.iota {dimensions = array<i32: 1>} : vector<4x256xi32>
    %c16_i32 = arith.constant 16 : i32
    %c0_i32 = arith.constant 0 : i32
    %1 = arith.cmpi eq, %c16_i32, %c0_i32 : i32
    %c1_i32 = arith.constant 1 : i32
    %2 = arith.select %1, %c1_i32, %c16_i32 : i32
    %3 = vector.broadcast %2 : i32 to vector<4x256xi32>
    %4 = arith.remsi %0, %3 : vector<4x256xi32>
    %c0_i32_0 = arith.constant 0 : i32
    %5 = vector.broadcast %c0_i32_0 : i32 to vector<4x256xi32>
    %6 = arith.cmpi ne, %4, %5 : vector<4x256xi32>
    %c0_i32_1 = arith.constant 0 : i32
    %7 = vector.broadcast %c0_i32_1 : i32 to vector<4x256xi32>
    %8 = arith.cmpi slt, %4, %7 : vector<4x256xi32>
    %c0_i32_2 = arith.constant 0 : i32
    %9 = arith.cmpi slt, %2, %c0_i32_2 : i32
    %10 = vector.broadcast %9 : i1 to vector<4x256xi1>
    %11 = vector.broadcast %10 : vector<4x256xi1> to vector<4x256xi1>
    %12 = arith.xori %8, %11 : vector<4x256xi1>
    %13 = arith.andi %12, %6 : vector<4x256xi1>
    %14 = vector.broadcast %2 : i32 to vector<4x256xi32>
    %15 = arith.addi %4, %14 : vector<4x256xi32>
    %16 = arith.select %13, %15, %4 : vector<4x256xi1>, vector<4x256xi32>
    %c0 = arith.constant 0 : index
    %c0_3 = arith.constant 0 : index
    %17 = vector.load %arg2[%c0, %c0_3] : memref<4x36xf32, #tpu.memory_space<vmem>>, vector<4x36xf32>
    %c0_4 = arith.constant 0 : index
    %c0_5 = arith.constant 0 : index
    %18 = vector.load %arg3[%c0_4, %c0_5] : memref<4x1xf32, #tpu.memory_space<vmem>>, vector<4x1xf32>
    %c0_6 = arith.constant 0 : index
    %c0_7 = arith.constant 0 : index
    %19 = vector.load %arg4[%c0_6, %c0_7] : memref<4x36xf32, #tpu.memory_space<vmem>>, vector<4x36xf32>
    %c0_8 = arith.constant 0 : index
    %c0_9 = arith.constant 0 : index
    %20 = vector.load %arg5[%c0_8, %c0_9] : memref<4x1xf32, #tpu.memory_space<vmem>>, vector<4x1xf32>
    %c0_i32_10 = arith.constant 0 : i32
    %c1_i32_11 = arith.constant 1 : i32
    %21 = arith.muli %c0_i32_10, %c1_i32_11 : i32
    %c0_i32_12 = arith.constant 0 : i32
    %22 = arith.addi %c0_i32_12, %21 : i32
    %23 = arith.index_cast %22 : i32 to index
    %c0_13 = arith.constant 0 : index
    %c0_14 = arith.constant 0 : index
    %24 = vector.load %arg1[%23, %c0_13, %c0_14] : memref<1x4x256xf32, #tpu.memory_space<vmem>>, vector<1x4x256xf32>
    %25 = vector.shape_cast %24 : vector<1x4x256xf32> to vector<4x256xf32>
    %c1_i32_15 = arith.constant 1 : i32
    %26 = tpu.dynamic_rotate %25 by %c1_i32_15 dim 1 : vector<4x256xf32>, i32 -> vector<4x256xf32>
    %c241_i32 = arith.constant 241 : i32
    %27 = tpu.dynamic_rotate %25 by %c241_i32 dim 1 : vector<4x256xf32>, i32 -> vector<4x256xf32>
    %c1_i32_16 = arith.constant 1 : i32
    %28 = vector.broadcast %c1_i32_16 : i32 to vector<4x256xi32>
    %29 = arith.cmpi slt, %16, %28 : vector<4x256xi32>
    %30 = arith.select %29, %27, %26 : vector<4x256xi1>, vector<4x256xf32>
    %c255_i32 = arith.constant 255 : i32
    %31 = tpu.dynamic_rotate %25 by %c255_i32 dim 1 : vector<4x256xf32>, i32 -> vector<4x256xf32>
    %c15_i32 = arith.constant 15 : i32
    %32 = tpu.dynamic_rotate %25 by %c15_i32 dim 1 : vector<4x256xf32>, i32 -> vector<4x256xf32>
    %c15_i32_17 = arith.constant 15 : i32
    %33 = vector.broadcast %c15_i32_17 : i32 to vector<4x256xi32>
    %34 = arith.cmpi sge, %16, %33 : vector<4x256xi32>
    %35 = arith.select %34, %32, %31 : vector<4x256xi1>, vector<4x256xf32>
    %36 = tpu.concatenate %30, %25, %35 in 0 : vector<4x256xf32>, vector<4x256xf32>, vector<4x256xf32> -> vector<12x256xf32>
    %c16_i32_18 = arith.constant 16 : i32
    %37 = tpu.dynamic_rotate %36 by %c16_i32_18 dim 1 : vector<12x256xf32>, i32 -> vector<12x256xf32>
    %c240_i32 = arith.constant 240 : i32
    %38 = tpu.dynamic_rotate %36 by %c240_i32 dim 1 : vector<12x256xf32>, i32 -> vector<12x256xf32>
    %39 = tpu.concatenate %37, %36, %38 in 0 : vector<12x256xf32>, vector<12x256xf32>, vector<12x256xf32> -> vector<36x256xf32>
    %cst = arith.constant dense<0.000000e+00> : vector<4x256xf32>
    %40 = tpu.matmul %17, %39, %cst {dimension_numbers = #tpu.dot_dimension_numbers<[1], [0], [0], [1], [0, 0, 1, 1], [], []>} : vector<4x36xf32>, vector<36x256xf32>, vector<4x256xf32> -> vector<4x256xf32>
    %41 = vector.broadcast %18 : vector<4x1xf32> to vector<4x256xf32>
    %42 = arith.addf %40, %41 : vector<4x256xf32>
    %cst_19 = arith.constant 5.000000e-01 : f32
    %43 = vector.broadcast %cst_19 : f32 to vector<4x256xf32>
    %44 = arith.mulf %43, %42 : vector<4x256xf32>
    %cst_20 = arith.constant 0.707106769 : f32
    %45 = vector.broadcast %cst_20 : f32 to vector<4x256xf32>
    %46 = arith.mulf %42, %45 : vector<4x256xf32>
    %cst_21 = arith.constant -4.000000e+00 : f32
    %cst_22 = arith.constant 4.000000e+00 : f32
    %47 = vector.broadcast %cst_21 : f32 to vector<4x256xf32>
    %48 = arith.maximumf %47, %46 : vector<4x256xf32>
    %49 = vector.broadcast %cst_22 : f32 to vector<4x256xf32>
    %50 = arith.minimumf %49, %48 : vector<4x256xf32>
    %51 = arith.mulf %50, %50 : vector<4x256xf32>
    %cst_23 = arith.constant 2.29050653E-4 : f32
    %52 = vector.broadcast %cst_23 : f32 to vector<4x256xf32>
    %53 = arith.mulf %52, %51 : vector<4x256xf32>
    %cst_24 = arith.constant 0.00340829091 : f32
    %54 = vector.broadcast %cst_24 : f32 to vector<4x256xf32>
    %55 = arith.addf %53, %54 : vector<4x256xf32>
    %56 = arith.mulf %55, %51 : vector<4x256xf32>
    %cst_25 = arith.constant 0.0509556942 : f32
    %57 = vector.broadcast %cst_25 : f32 to vector<4x256xf32>
    %58 = arith.addf %56, %57 : vector<4x256xf32>
    %59 = arith.mulf %58, %51 : vector<4x256xf32>
    %cst_26 = arith.constant 0.185208321 : f32
    %60 = vector.broadcast %cst_26 : f32 to vector<4x256xf32>
    %61 = arith.addf %59, %60 : vector<4x256xf32>
    %62 = arith.mulf %61, %51 : vector<4x256xf32>
    %cst_27 = arith.constant 1.12837911 : f32
    %63 = vector.broadcast %cst_27 : f32 to vector<4x256xf32>
    %64 = arith.addf %62, %63 : vector<4x256xf32>
    %cst_28 = arith.constant -1.17916031E-7 : f32
    %65 = vector.broadcast %cst_28 : f32 to vector<4x256xf32>
    %66 = arith.mulf %65, %51 : vector<4x256xf32>
    %cst_29 = arith.constant 2.35479656E-5 : f32
    %67 = vector.broadcast %cst_29 : f32 to vector<4x256xf32>
    %68 = arith.addf %66, %67 : vector<4x256xf32>
    %69 = arith.mulf %68, %51 : vector<4x256xf32>
    %cst_30 = arith.constant 0.00101796258 : f32
    %70 = vector.broadcast %cst_30 : f32 to vector<4x256xf32>
    %71 = arith.addf %69, %70 : vector<4x256xf32>
    %72 = arith.mulf %71, %51 : vector<4x256xf32>
    %cst_31 = arith.constant 0.0140704699 : f32
    %73 = vector.broadcast %cst_31 : f32 to vector<4x256xf32>
    %74 = arith.addf %72, %73 : vector<4x256xf32>
    %75 = arith.mulf %74, %51 : vector<4x256xf32>
    %cst_32 = arith.constant 0.110985048 : f32
    %76 = vector.broadcast %cst_32 : f32 to vector<4x256xf32>
    %77 = arith.addf %75, %76 : vector<4x256xf32>
    %78 = arith.mulf %77, %51 : vector<4x256xf32>
    %cst_33 = arith.constant 0.497469246 : f32
    %79 = vector.broadcast %cst_33 : f32 to vector<4x256xf32>
    %80 = arith.addf %78, %79 : vector<4x256xf32>
    %81 = arith.mulf %80, %51 : vector<4x256xf32>
    %cst_34 = arith.constant 1.000000e+00 : f32
    %82 = vector.broadcast %cst_34 : f32 to vector<4x256xf32>
    %83 = arith.addf %81, %82 : vector<4x256xf32>
    %84 = tpu.reciprocal %83 {approx = true} : vector<4x256xf32> -> vector<4x256xf32>
    %85 = arith.mulf %83, %84 : vector<4x256xf32>
    %cst_35 = arith.constant 2.000000e+00 : f32
    %86 = vector.broadcast %cst_35 : f32 to vector<4x256xf32>
    %87 = arith.subf %86, %85 : vector<4x256xf32>
    %88 = arith.mulf %84, %87 : vector<4x256xf32>
    %89 = arith.mulf %50, %64 : vector<4x256xf32>
    %90 = arith.mulf %89, %88 : vector<4x256xf32>
    %cst_36 = arith.constant 1.000000e+00 : f32
    %91 = vector.broadcast %cst_36 : f32 to vector<4x256xf32>
    %92 = arith.addf %91, %90 : vector<4x256xf32>
    %93 = arith.mulf %44, %92 : vector<4x256xf32>
    %c1_i32_37 = arith.constant 1 : i32
    %94 = tpu.dynamic_rotate %93 by %c1_i32_37 dim 1 : vector<4x256xf32>, i32 -> vector<4x256xf32>
    %c241_i32_38 = arith.constant 241 : i32
    %95 = tpu.dynamic_rotate %93 by %c241_i32_38 dim 1 : vector<4x256xf32>, i32 -> vector<4x256xf32>
    %c1_i32_39 = arith.constant 1 : i32
    %96 = vector.broadcast %c1_i32_39 : i32 to vector<4x256xi32>
    %97 = arith.cmpi slt, %16, %96 : vector<4x256xi32>
    %98 = arith.select %97, %95, %94 : vector<4x256xi1>, vector<4x256xf32>
    %c255_i32_40 = arith.constant 255 : i32
    %99 = tpu.dynamic_rotate %93 by %c255_i32_40 dim 1 : vector<4x256xf32>, i32 -> vector<4x256xf32>
    %c15_i32_41 = arith.constant 15 : i32
    %100 = tpu.dynamic_rotate %93 by %c15_i32_41 dim 1 : vector<4x256xf32>, i32 -> vector<4x256xf32>
    %c15_i32_42 = arith.constant 15 : i32
    %101 = vector.broadcast %c15_i32_42 : i32 to vector<4x256xi32>
    %102 = arith.cmpi sge, %16, %101 : vector<4x256xi32>
    %103 = arith.select %102, %100, %99 : vector<4x256xi1>, vector<4x256xf32>
    %104 = tpu.concatenate %98, %93, %103 in 0 : vector<4x256xf32>, vector<4x256xf32>, vector<4x256xf32> -> vector<12x256xf32>
    %c16_i32_43 = arith.constant 16 : i32
    %105 = tpu.dynamic_rotate %104 by %c16_i32_43 dim 1 : vector<12x256xf32>, i32 -> vector<12x256xf32>
    %c240_i32_44 = arith.constant 240 : i32
    %106 = tpu.dynamic_rotate %104 by %c240_i32_44 dim 1 : vector<12x256xf32>, i32 -> vector<12x256xf32>
    %107 = tpu.concatenate %105, %104, %106 in 0 : vector<12x256xf32>, vector<12x256xf32>, vector<12x256xf32> -> vector<36x256xf32>
    %cst_45 = arith.constant dense<0.000000e+00> : vector<4x256xf32>
    %108 = tpu.matmul %19, %107, %cst_45 {dimension_numbers = #tpu.dot_dimension_numbers<[1], [0], [0], [1], [0, 0, 1, 1], [], []>} : vector<4x36xf32>, vector<36x256xf32>, vector<4x256xf32> -> vector<4x256xf32>
    %109 = vector.broadcast %20 : vector<4x1xf32> to vector<4x256xf32>
    %110 = arith.addf %108, %109 : vector<4x256xf32>
    %111 = arith.addf %110, %25 : vector<4x256xf32>
    %cst_46 = arith.constant 5.000000e-01 : f32
    %112 = vector.broadcast %cst_46 : f32 to vector<4x256xf32>
    %113 = arith.mulf %112, %111 : vector<4x256xf32>
    %cst_47 = arith.constant 0.707106769 : f32
    %114 = vector.broadcast %cst_47 : f32 to vector<4x256xf32>
    %115 = arith.mulf %111, %114 : vector<4x256xf32>
    %cst_48 = arith.constant -4.000000e+00 : f32
    %cst_49 = arith.constant 4.000000e+00 : f32
    %116 = vector.broadcast %cst_48 : f32 to vector<4x256xf32>
    %117 = arith.maximumf %116, %115 : vector<4x256xf32>
    %118 = vector.broadcast %cst_49 : f32 to vector<4x256xf32>
    %119 = arith.minimumf %118, %117 : vector<4x256xf32>
    %120 = arith.mulf %119, %119 : vector<4x256xf32>
    %cst_50 = arith.constant 2.29050653E-4 : f32
    %121 = vector.broadcast %cst_50 : f32 to vector<4x256xf32>
    %122 = arith.mulf %121, %120 : vector<4x256xf32>
    %cst_51 = arith.constant 0.00340829091 : f32
    %123 = vector.broadcast %cst_51 : f32 to vector<4x256xf32>
    %124 = arith.addf %122, %123 : vector<4x256xf32>
    %125 = arith.mulf %124, %120 : vector<4x256xf32>
    %cst_52 = arith.constant 0.0509556942 : f32
    %126 = vector.broadcast %cst_52 : f32 to vector<4x256xf32>
    %127 = arith.addf %125, %126 : vector<4x256xf32>
    %128 = arith.mulf %127, %120 : vector<4x256xf32>
    %cst_53 = arith.constant 0.185208321 : f32
    %129 = vector.broadcast %cst_53 : f32 to vector<4x256xf32>
    %130 = arith.addf %128, %129 : vector<4x256xf32>
    %131 = arith.mulf %130, %120 : vector<4x256xf32>
    %cst_54 = arith.constant 1.12837911 : f32
    %132 = vector.broadcast %cst_54 : f32 to vector<4x256xf32>
    %133 = arith.addf %131, %132 : vector<4x256xf32>
    %cst_55 = arith.constant -1.17916031E-7 : f32
    %134 = vector.broadcast %cst_55 : f32 to vector<4x256xf32>
    %135 = arith.mulf %134, %120 : vector<4x256xf32>
    %cst_56 = arith.constant 2.35479656E-5 : f32
    %136 = vector.broadcast %cst_56 : f32 to vector<4x256xf32>
    %137 = arith.addf %135, %136 : vector<4x256xf32>
    %138 = arith.mulf %137, %120 : vector<4x256xf32>
    %cst_57 = arith.constant 0.00101796258 : f32
    %139 = vector.broadcast %cst_57 : f32 to vector<4x256xf32>
    %140 = arith.addf %138, %139 : vector<4x256xf32>
    %141 = arith.mulf %140, %120 : vector<4x256xf32>
    %cst_58 = arith.constant 0.0140704699 : f32
    %142 = vector.broadcast %cst_58 : f32 to vector<4x256xf32>
    %143 = arith.addf %141, %142 : vector<4x256xf32>
    %144 = arith.mulf %143, %120 : vector<4x256xf32>
    %cst_59 = arith.constant 0.110985048 : f32
    %145 = vector.broadcast %cst_59 : f32 to vector<4x256xf32>
    %146 = arith.addf %144, %145 : vector<4x256xf32>
    %147 = arith.mulf %146, %120 : vector<4x256xf32>
    %cst_60 = arith.constant 0.497469246 : f32
    %148 = vector.broadcast %cst_60 : f32 to vector<4x256xf32>
    %149 = arith.addf %147, %148 : vector<4x256xf32>
    %150 = arith.mulf %149, %120 : vector<4x256xf32>
    %cst_61 = arith.constant 1.000000e+00 : f32
    %151 = vector.broadcast %cst_61 : f32 to vector<4x256xf32>
    %152 = arith.addf %150, %151 : vector<4x256xf32>
    %153 = tpu.reciprocal %152 {approx = true} : vector<4x256xf32> -> vector<4x256xf32>
    %154 = arith.mulf %152, %153 : vector<4x256xf32>
    %cst_62 = arith.constant 2.000000e+00 : f32
    %155 = vector.broadcast %cst_62 : f32 to vector<4x256xf32>
    %156 = arith.subf %155, %154 : vector<4x256xf32>
    %157 = arith.mulf %153, %156 : vector<4x256xf32>
    %158 = arith.mulf %119, %133 : vector<4x256xf32>
    %159 = arith.mulf %158, %157 : vector<4x256xf32>
    %cst_63 = arith.constant 1.000000e+00 : f32
    %160 = vector.broadcast %cst_63 : f32 to vector<4x256xf32>
    %161 = arith.addf %160, %159 : vector<4x256xf32>
    %162 = arith.mulf %113, %161 : vector<4x256xf32>
    %163 = arith.index_cast %22 : i32 to index
    %c0_64 = arith.constant 0 : index
    %c0_65 = arith.constant 0 : index
    %164 = vector.load %arg6[%163, %c0_64, %c0_65] : memref<1x4x256xf32, #tpu.memory_space<vmem>>, vector<1x4x256xf32>
    %165 = vector.shape_cast %164 : vector<1x4x256xf32> to vector<4x256xf32>
    %166 = vector.shape_cast %162 : vector<4x256xf32> to vector<1x4x256xf32>
    tpu.vector_store %arg6[%163, %c0_64, %c0_65], %166 {strides = array<i32>} : memref<1x4x256xf32, #tpu.memory_space<vmem>>, vector<1x4x256xf32>,
    %c1_i32_66 = arith.constant 1 : i32
    return
  }
  func.func @transform_0(%arg0: i32) -> (i32, i32, i32) {
    %c0_i32 = arith.constant 0 : i32
    %c0_i32_0 = arith.constant 0 : i32
    %c0_i32_1 = arith.constant 0 : i32
    return %arg0, %c0_i32, %c0_i32_0 : i32, i32, i32
  }
  func.func @transform_1(%arg0: i32) -> (i32, i32) {
    %c0_i32 = arith.constant 0 : i32
    %c0_i32_0 = arith.constant 0 : i32
    %c0_i32_1 = arith.constant 0 : i32
    return %c0_i32, %c0_i32_0 : i32, i32
  }
  func.func @transform_2(%arg0: i32) -> (i32, i32) {
    %c0_i32 = arith.constant 0 : i32
    %c0_i32_0 = arith.constant 0 : i32
    %c0_i32_1 = arith.constant 0 : i32
    return %c0_i32, %c0_i32_0 : i32, i32
  }
  func.func @transform_3(%arg0: i32) -> (i32, i32) {
    %c0_i32 = arith.constant 0 : i32
    %c0_i32_0 = arith.constant 0 : i32
    %c0_i32_1 = arith.constant 0 : i32
    return %c0_i32, %c0_i32_0 : i32, i32
  }
  func.func @transform_4(%arg0: i32) -> (i32, i32) {
    %c0_i32 = arith.constant 0 : i32
    %c0_i32_0 = arith.constant 0 : i32
    %c0_i32_1 = arith.constant 0 : i32
    return %c0_i32, %c0_i32_0 : i32, i32
  }
  func.func @transform_5(%arg0: i32) -> (i32, i32, i32) {
    %c0_i32 = arith.constant 0 : i32
    %c0_i32_0 = arith.constant 0 : i32
    %c0_i32_1 = arith.constant 0 : i32
    return %arg0, %c0_i32, %c0_i32_0 : i32, i32, i32
  }
}

</mosaic_0001>

<bundles_post_ra>
// kernel: resblock_forward.1
= control target key start
LH: loop header
LB: loop body
LE: loop exit
PB: predicated region body
PF: predicated region fallthrough
CT: control target
= control target key end

     0   :  { %s947_s18 = smov 0   ;;  %s1150_s0 = inlined_call_operand.vmem [shape: f32[2,4,256], index: 0, kind: input, shape index: {}]   ;;  %s1151_s1 = inlined_call_operand.vmem [shape: f32[4,36], index: 1, kind: input, shape index: {}]   ;;  %s1152_s2 = inlined_call_operand.vmem [shape: f32[4,1], index: 2, kind: input, shape index: {}]   ;;  %s1153_s3 = inlined_call_operand.vmem [shape: f32[4,36], index: 3, kind: input, shape index: {}]   ;;  %s1154_s4 = inlined_call_operand.vmem [shape: f32[4,1], index: 4, kind: input, shape index: {}]   ;;  %s1155_s5 = inlined_call_operand.vmem [shape: f32[2,4,256], index: 5, kind: output, shape index: {}]  }
   0x1 LB: > { %s784_s19 = sadd.s32 4294967295, %s907_s18   ;;  %p788_p0 = scmp.ge.s32.totalorder %s907_s18, 1  ;;  %s907_s18 = sphi %s947_s18, %s15_s18  }
   0x2   : > { %p187_p1 = scmp.lt.s32.totalorder %s907_s18, 3 }
   0x4   : > { %p188_p2 = pnand %p788_p0, %p187_p1 }
   0x5   : > { %p215_p3 = scmp.lt.s32.totalorder (!%p188_p2), %s784_s19, 1  ;;  %s909_s24 = smov (!%p188_p2), 127   ;;  %v225_v3 = vlaneseq (!%p188_p2)  ;;  %vm298_vm8 = vcmask (!%p188_p2), 1043456   ;;  %v915_v45 = vmov (!%p188_p2), 0.0   ;;  %v916_v46 = vmov (!%p188_p2), 0  }
   0x6   : > { %191 = sbr.rel (%p188_p2) target bundleno = 1080 (0x438), region = 40  ;;  %s910_s25 = smov (!%p188_p2), 1   ;;  %422 = vmatprep.mubr.f32.mxu0 (!%p188_p2), %v915_v45  ;;  %864 = vset.pattern.permute.xlu1 (!%p188_p2), %v916_v46  ;;  %v253_v47 = vld [vmem:[%s1152_s2] sm:$0xf] (!%p188_p2)  ;;  %vm348_vm11 = vcmask (!%p188_p2), 293888  }
   0x7   : > { %s911_s26 = smov (!%p188_p2), 113   ;;  %s912_s27 = smov (!%p188_p2), 15   ;;  %v981_v4 = vand.u32 (!%p188_p2), 127, %v225_v3  ;;  %649 = vmatprep.mubr.f32.mxu1 (!%p188_p2), %v915_v45  ;;  %890 = vset.pattern.permute.xlu0 (!%p188_p2), %v916_v46  ;;  %v255_v20 = vld [vmem:[%s1154_s4] sm:$0xf] (!%p188_p2) }
   0x8   : > { %s913_s28 = smov (!%p188_p2), 16   ;;  %s914_s29 = smov (!%p188_p2), 112  }
   0x9   : > { %v227_v6 = vadd.s32 (!%p188_p2), 128, %v981_v4  ;;  %v232_v8 = vand.u32 (!%p188_p2), 15, %v981_v4  ;;  %vm282_vm0 = vcmp.lt.s32.totalorder (!%p188_p2), %v981_v4, 127  ;;  %vm264_vm1 = vcmp.lt.s32.totalorder (!%p188_p2), %v981_v4, 1 }
   0xa   : > { %vm271_vm2 = vcmp.lt.s32.totalorder (!%p188_p2), %v981_v4, 113  ;;  %vm289_vm5 = vcmp.lt.s32.totalorder (!%p188_p2), %v981_v4, 15  ;;  %vm309_vm9 = vcmp.lt.s32.totalorder (!%p188_p2), %v981_v4, 16  ;;  %vm322_vm10 = vcmp.lt.s32.totalorder (!%p188_p2), %v981_v4, 112 }
   0xb   : > { %v239_v9 = vand.u32 (!%p188_p2), 15, %v227_v6  ;;  %vm988_vm3 = vcmp.lt.s32.totalorder (!%p188_p2), %v232_v8, 1  ;;  %vm999_vm6 = vcmp.ge.s32.totalorder (!%p188_p2), %v232_v8, 15 }
   0xd   : > { %s1165_s19 = smov (!%p215_p3, %s784_s19), 1  ;;  %vm992_vm4 = vcmp.lt.s32.totalorder %v239_v9, 1  ;;  %vm1003_vm7 = vcmp.ge.s32.totalorder %v239_v9, 15 }
   0xe   : > { %s805_s20 = sshll.u32 %s1165_s19, 3 }
   0xf   : > { %s219_s23 = scalar_lea.vmem %s1150_s0, %s805_s20  ;;  %s224_s15 = scalar_lea.vmem %s1155_s5, %s805_s20 }
  0x10   : > { %v963_v0 = vld [vmem:[%s219_s23] sm:$0xff] }
  0x11   : > { %278 = vrot.lane.b32.xlu1 %v963_v0, %s909_s24  ;;  %v969_v1 = vcombine.high %v963_v0, %v963_v0  ;;  %v296_v18 = vcombine.low %v963_v0, %v963_v0 }
  0x13   : > { %v839_v2 = vpack.i.bf16 %v969_v1, %v963_v0 }
  0x15   : > { %280 = vrot.lane.b32.xlu1 %v969_v1, %s909_s24  ;;  %840 = vrot.lane.b32.xlu0 %v839_v2, %s910_s25 }
  0x19   : > { %845 = vrot.lane.b32.xlu0 %v839_v2, %s911_s26  ;;  %287 = vrot.lane.b32.xlu1 %v969_v1, %s912_s27 }
  0x1d   : > { %285 = vrot.lane.b32.xlu0 %v963_v0, %s912_s27 }
  0x83   : > { %v279_v5 = vpop.permute.xlu1 %278 }
  0x87   : > { %v841_v7 = vpop.permute.xlu0 %840  ;;  %v281_v10 = vpop.permute.xlu1 %280 }
  0x88   : > { %v843_v11 = vunpack.i.h.bf16 %v841_v7  ;;  %v842_v12 = vunpack.i.l.bf16 %v841_v7  ;;  %v283_v26 = vsel %vm282_vm0, %v279_v5, %v281_v10  ;;  %v284_v27 = vsel %vm282_vm0, %v281_v10, %v279_v5 }
  0x8a   : > { %v265_v22 = vsel %vm264_vm1, %v842_v12, %v843_v11  ;;  %v266_v23 = vsel %vm264_vm1, %v843_v11, %v842_v12  ;;  %v252_v11 = vld [vmem:[%s1151_s1] sm:$0xf] }
  0x8b   : > { %v846_v13 = vpop.permute.xlu0 %845  ;;  %v288_v19 = vpop.permute.xlu1 %287 }
  0x8c   : > { %v848_v15 = vunpack.i.h.bf16 %v846_v13  ;;  %v847_v16 = vunpack.i.l.bf16 %v846_v13 }
  0x8e   : > { %v272_v24 = vsel %vm271_vm2, %v847_v16, %v848_v15  ;;  %v273_v25 = vsel %vm271_vm2, %v848_v15, %v847_v16 }
  0x8f   : > { %v286_v28 = vpop.permute.xlu0 %285  ;;  %v276_v29 = vsel %vm988_vm3, %v272_v24, %v266_v23  ;;  %v277_v30 = vsel %vm992_vm4, %v273_v25, %v265_v22 }
  0x90   : > { %v290_v31 = vsel %vm289_vm5, %v286_v28, %v288_v19  ;;  %v291_v32 = vsel %vm289_vm5, %v288_v19, %v286_v28  ;;  %v299_v33 = vsel %vm298_vm8, %v276_v29, %v296_v18  ;;  %v300_v34 = vsel %vm298_vm8, %v277_v30, %v963_v0 }
  0x91   : > { %v294_v35 = vsel %vm999_vm6, %v291_v32, %v283_v26  ;;  %v295_v36 = vsel %vm1003_vm7, %v290_v31, %v284_v27  ;;  %v854_v37 = vpack.i.bf16 %v300_v34, %v299_v33  ;;  %v332_v41 = vrot.slane %v300_v34, 4 }
  0x92   : > { %v333_v38 = vrot.slane %v294_v35, 4  ;;  %v335_v39 = vrot.slane %v295_v36, 4  ;;  %v849_v40 = vpack.i.bf16 %v295_v36, %v294_v35  ;;  %v331_v42 = vrot.slane %v299_v33, 4 }
  0x93   : > { %855 = vrot.lane.b32.xlu1 %v854_v37, %s913_s28 }
  0x94   : > { %850 = vrot.lane.b32.xlu0 %v849_v40, %s913_s28  ;;  %v336_v43 = vsel %vm298_vm8, %v332_v41, %v335_v39  ;;  %v334_v44 = vsel %vm298_vm8, %v331_v42, %v333_v38 }
  0x97   : > { %316 = vrot.lane.b32.xlu1 %v294_v35, %s914_s29 }
  0x98   : > { %860 = vrot.lane.b32.xlu0 %v854_v37, %s914_s29 }
  0x9b   : > { %345 = vperm.xlu1 %864, %v253_v47  }
  0x9c   : > { %320 = vrot.lane.b32.xlu0 %v295_v36, %s914_s29 }
 0x105   : > { %v856_v48 = vpop.permute.xlu1 %855 }
 0x106   : > { %v858_v49 = vunpack.i.h.bf16 %v856_v48  ;;  %v857_v50 = vunpack.i.l.bf16 %v856_v48  ;;  %v851_v51 = vpop.permute.xlu0 %850 }
 0x107   : > { %v853_v52 = vunpack.i.h.bf16 %v851_v51  ;;  %v852_v53 = vunpack.i.l.bf16 %v851_v51 }
 0x108   : > { %v310_v57 = vsel %vm309_vm9, %v857_v50, %v858_v49  ;;  %v312_v59 = vsel %vm309_vm9, %v858_v49, %v857_v50 }
 0x109   : > { %v311_v54 = vsel %vm309_vm9, %v852_v53, %v853_v52  ;;  %v313_v55 = vsel %vm309_vm9, %v853_v52, %v852_v53  ;;  %v317_v9 = vpop.permute.xlu1 %316 }
 0x10a   : > { %v861_v56 = vpop.permute.xlu0 %860  ;;  %v342_v58 = vsel %vm298_vm8, %v311_v54, %v332_v41  ;;  %v341_v60 = vsel %vm298_vm8, %v313_v55, %v331_v42 }
 0x10b   : > { %v863_v61 = vunpack.i.h.bf16 %v861_v56  ;;  %v862_v62 = vunpack.i.l.bf16 %v861_v56  ;;  %v807_v63 = vpack.c.bf16 %v342_v58, %v310_v57  ;;  %v809_v2 = vpack.c.bf16 %v341_v60, %v312_v59 }
 0x10d   : > { %808 = vmatprep.subr.bf16.mxu0 %v807_v63  ;;  %v325_v3 = vsel %vm322_vm10, %v863_v61, %v862_v62  ;;  %v323_v5 = vsel %vm322_vm10, %v862_v62, %v863_v61 }
 0x10e   : > { %810 = vmatpush1.bf16.msra.mxu0 %v809_v2  ;;  %v811_v6 = vpack.c.bf16 %v325_v3, %v336_v43  ;;  %v321_v7 = vpop.permute.xlu0 %320  ;;  %v813_v8 = vpack.c.bf16 %v323_v5, %v334_v44 }
 0x10f   : > { %v326_v10 = vsel %vm322_vm10, %v321_v7, %v317_v9  ;;  %v324_v12 = vsel %vm322_vm10, %v317_v9, %v321_v7 }
 0x110   : > { %812 = vmatprep.subr.bf16.mxu0 %v811_v6 }
 0x112   : > { %814 = vmatpush1.bf16.msra.mxu0 %v813_v8 }
 0x113   : > { %793 = vmatprep.subr.msk.mxu0 %vm298_vm8, %v326_v10 }
 0x116   : > { %794 = vmatpush1.msk.msra.mxu0 %vm298_vm8, %v324_v12 }
 0x117   : > { %795 = vmatmul.mubr.msk.f32.vlgmr.msra.gmra.mrb[0].mxu0 %vm348_vm11, %v252_v11 }
 0x11a   : > { %v346_v13 = vpop.permute.xlu1 %345 }
 0x1ea   : > { %v424_v15 = vpop.f32.mrb[0].mxu0 }
 0x1eb   : > { %v1070_v16 = vadd.f32 %v424_v15, %v346_v13  ;;  %v426_v18 = vpop.f32.mrb[1].mxu0 }
 0x1ec   : > { %v427_v19 = vadd.f32 %v426_v18, %v346_v13 }
 0x1ed   : > { %v431_v22 = vmul.f32 0.70710677, %v1070_v16 }
 0x1ee   : > { %v432_v23 = vmul.f32 0.70710677, %v427_v19 }
 0x1ef   : > { %v796_v24 = vclamps-f32 %v431_v22, 4.0 }
 0x1f0   : > { %v797_v25 = vclamps-f32 %v432_v23, 4.0 }
 0x1f1   : > { %v437_v26 = vmul.f32 %v796_v24, %v796_v24 }
 0x1f2   : > { %v438_v27 = vmul.f32 %v797_v25, %v797_v25 }
 0x1f3   : > { %v455_v28 = vmul.f32 -1.1791603e-07, %v437_v26  ;;  %v439_v35 = vmul.f32 0.00022905065, %v437_v26 }
 0x1f4   : > { %v456_v29 = vmul.f32 -1.1791603e-07, %v438_v27  ;;  %v440_v38 = vmul.f32 0.00022905065, %v438_v27 }
 0x1f5   : > { %v457_v30 = vadd.f32 2.3547966e-05, %v455_v28  ;;  %v441_v41 = vadd.f32 0.003408291, %v439_v35 }
 0x1f6   : > { %v458_v31 = vadd.f32 2.3547966e-05, %v456_v29  ;;  %v442_v44 = vadd.f32 0.003408291, %v440_v38  ;;  %v429_v29 = vmul.f32 0.5, %v1070_v16 }
 0x1f7   : > { %v459_v32 = vmul.f32 %v457_v30, %v437_v26  ;;  %v443_v47 = vmul.f32 %v441_v41, %v437_v26 }
 0x1f8   : > { %v460_v33 = vmul.f32 %v458_v31, %v438_v27  ;;  %v444_v50 = vmul.f32 %v442_v44, %v438_v27  ;;  %v430_v31 = vmul.f32 0.5, %v427_v19 }
 0x1f9   : > { %v461_v34 = vadd.f32 0.0010179626, %v459_v32  ;;  %v445_v53 = vadd.f32 0.050955694, %v443_v47 }
 0x1fa   : > { %v462_v36 = vadd.f32 0.0010179626, %v460_v33  ;;  %v446_v56 = vadd.f32 0.050955694, %v444_v50 }
 0x1fb   : > { %v463_v37 = vmul.f32 %v461_v34, %v437_v26  ;;  %v447_v59 = vmul.f32 %v445_v53, %v437_v26 }
 0x1fc   : > { %v464_v39 = vmul.f32 %v462_v36, %v438_v27  ;;  %v448_v61 = vmul.f32 %v446_v56, %v438_v27 }
 0x1fd   : > { %v465_v40 = vadd.f32 0.01407047, %v463_v37  ;;  %v449_v62 = vadd.f32 0.18520832, %v447_v59 }
 0x1fe   : > { %v466_v42 = vadd.f32 0.01407047, %v464_v39  ;;  %v450_v63 = vadd.f32 0.18520832, %v448_v61 }
 0x1ff   : > { %v467_v43 = vmul.f32 %v465_v40, %v437_v26  ;;  %v451_v2 = vmul.f32 %v449_v62, %v437_v26 }
 0x200   : > { %v468_v45 = vmul.f32 %v466_v42, %v438_v27  ;;  %v452_v3 = vmul.f32 %v450_v63, %v438_v27 }
 0x201   : > { %v469_v46 = vadd.f32 0.11098505, %v467_v43  ;;  %v453_v7 = vadd.f32 1.1283791, %v451_v2 }
 0x202   : > { %v470_v48 = vadd.f32 0.11098505, %v468_v45  ;;  %v454_v9 = vadd.f32 1.1283791, %v452_v3 }
 0x203   : > { %v471_v49 = vmul.f32 %v469_v46, %v437_v26  ;;  %v487_v15 = vmul.f32 %v796_v24, %v453_v7 }
 0x204   : > { %v472_v51 = vmul.f32 %v470_v48, %v438_v27  ;;  %v488_v22 = vmul.f32 %v797_v25, %v454_v9 }
 0x205   : > { %v473_v52 = vadd.f32 0.49746925, %v471_v49 }
 0x206   : > { %v474_v54 = vadd.f32 0.49746925, %v472_v51 }
 0x207   : > { %v475_v55 = vmul.f32 %v473_v52, %v437_v26 }
 0x208   : > { %v476_v57 = vmul.f32 %v474_v54, %v438_v27 }
 0x209   : > { %v477_v58 = vadd.f32 1.0, %v475_v55 }
 0x20a   : > { %v478_v60 = vadd.f32 1.0, %v476_v57 }
 0x20b   : > { %893 = vrcp.f32 %v477_v58 }
 0x20c   : > { %895 = vrcp.f32 %v478_v60 }
 0x215   : > { %v894_v5 = vpop.eup %893 }
 0x216   : > { %v896_v6 = vpop.eup %895  ;;  %v481_v8 = vmul.f32 %v894_v5, %v477_v58 }
 0x217   : > { %v482_v10 = vmul.f32 %v896_v6, %v478_v60 }
 0x218   : > { %v483_v11 = vsub.f32 2.0, %v481_v8 }
 0x219   : > { %v484_v12 = vsub.f32 2.0, %v482_v10 }
 0x21a   : > { %v485_v13 = vmul.f32 %v894_v5, %v483_v11 }
 0x21b   : > { %v486_v18 = vmul.f32 %v896_v6, %v484_v12 }
 0x21c   : > { %v489_v23 = vmul.f32 %v487_v15, %v485_v13 }
 0x21d   : > { %v490_v28 = vmul.f32 %v488_v22, %v486_v18 }
 0x21e   : > { %v491_v30 = vadd.f32 1.0, %v489_v23 }
 0x21f   : > { %v492_v26 = vadd.f32 1.0, %v490_v28 }
 0x220   : > { %v493_v27 = vmul.f32 %v491_v30, %v429_v29 }
 0x221   : > { %v494_v32 = vmul.f32 %v492_v26, %v430_v31 }
 0x222   : > { %509 = vrot.lane.b32.xlu0 %v493_v27, %s909_s24  ;;  %v525_v42 = vrot.slane %v493_v27, 4 }
 0x223   : > { %v870_v33 = vpack.i.bf16 %v494_v32, %v493_v27  ;;  %v526_v43 = vrot.slane %v494_v32, 4 }
 0x225   : > { %871 = vrot.lane.b32.xlu1 %v870_v33, %s911_s26 }
 0x226   : > { %866 = vrot.lane.b32.xlu0 %v870_v33, %s910_s25 }
 0x229   : > { %511 = vrot.lane.b32.xlu1 %v494_v32, %s909_s24 }
 0x22a   : > { %515 = vrot.lane.b32.xlu0 %v493_v27, %s912_s27 }
 0x22d   : > { %517 = vrot.lane.b32.xlu1 %v494_v32, %s912_s27  ;;  %v254_v32 = vld [vmem:[%s1153_s3] sm:$0xf] }
 0x294   : > { %v510_v24 = vpop.permute.xlu0 %509 }
 0x297   : > { %v872_v16 = vpop.permute.xlu1 %871 }
 0x298   : > { %v874_v25 = vunpack.i.h.bf16 %v872_v16  ;;  %v873_v19 = vunpack.i.l.bf16 %v872_v16  ;;  %v867_v34 = vpop.permute.xlu0 %866 }
 0x299   : > { %v869_v35 = vunpack.i.h.bf16 %v867_v34  ;;  %v868_v36 = vunpack.i.l.bf16 %v867_v34 }
 0x29a   : > { %v505_v37 = vsel %vm271_vm2, %v873_v19, %v874_v25  ;;  %v506_v38 = vsel %vm271_vm2, %v874_v25, %v873_v19 }
 0x29b   : > { %v499_v39 = vsel %vm264_vm1, %v868_v36, %v869_v35  ;;  %v500_v40 = vsel %vm264_vm1, %v869_v35, %v868_v36  ;;  %v512_v41 = vpop.permute.xlu1 %511 }
 0x29c   : > { %v507_v44 = vsel %vm988_vm3, %v505_v37, %v500_v40  ;;  %v508_v45 = vsel %vm992_vm4, %v506_v38, %v499_v39  ;;  %v516_v49 = vpop.permute.xlu0 %515  ;;  %v513_v51 = vsel %vm282_vm0, %v510_v24, %v512_v41  ;;  %v514_v52 = vsel %vm282_vm0, %v512_v41, %v510_v24 }
 0x29d   : > { %v529_v46 = vsel %vm298_vm8, %v507_v44, %v525_v42  ;;  %v530_v47 = vsel %vm298_vm8, %v508_v45, %v526_v43 }
 0x29e   : > { %v880_v48 = vpack.i.bf16 %v530_v47, %v529_v46  ;;  %v560_v55 = vrot.slane %v530_v47, 4  ;;  %v559_v59 = vrot.slane %v529_v46, 4 }
 0x29f   : > { %v518_v50 = vpop.permute.xlu1 %517 }
 0x2a0   : > { %v519_v14 = vsel %vm289_vm5, %v516_v49, %v518_v50  ;;  %v520_v17 = vsel %vm289_vm5, %v518_v50, %v516_v49  ;;  %881 = vrot.lane.b32.xlu1 %v880_v48, %s913_s28 }
 0x2a1   : > { %v521_v53 = vsel %vm999_vm6, %v520_v17, %v513_v51  ;;  %v522_v54 = vsel %vm1003_vm7, %v519_v14, %v514_v52 }
 0x2a2   : > { %v561_v56 = vrot.slane %v521_v53, 4  ;;  %v563_v57 = vrot.slane %v522_v54, 4  ;;  %v875_v58 = vpack.i.bf16 %v522_v54, %v521_v53 }
 0x2a4   : > { %876 = vrot.lane.b32.xlu0 %v875_v58, %s913_s28  ;;  %545 = vrot.lane.b32.xlu1 %v521_v53, %s914_s29  ;;  %v564_v60 = vsel %vm298_vm8, %v560_v55, %v563_v57  ;;  %v562_v61 = vsel %vm298_vm8, %v559_v59, %v561_v56 }
 0x2a8   : > { %886 = vrot.lane.b32.xlu0 %v880_v48, %s914_s29  ;;  %573 = vperm.xlu1 %864, %v255_v20  }
 0x2ac   : > { %549 = vrot.lane.b32.xlu0 %v522_v54, %s914_s29 }
 0x312   : > { %v882_v21 = vpop.permute.xlu1 %881 }
 0x313   : > { %v884_v62 = vunpack.i.h.bf16 %v882_v21  ;;  %v883_v63 = vunpack.i.l.bf16 %v882_v21 }
 0x315   : > { %v539_v9 = vsel %vm309_vm9, %v883_v63, %v884_v62  ;;  %v541_v11 = vsel %vm309_vm9, %v884_v62, %v883_v63 }
 0x316   : > { %v877_v2 = vpop.permute.xlu0 %876  ;;  %v546_v26 = vpop.permute.xlu1 %545 }
 0x317   : > { %v879_v3 = vunpack.i.h.bf16 %v877_v2  ;;  %v878_v5 = vunpack.i.l.bf16 %v877_v2 }
 0x319   : > { %v540_v6 = vsel %vm309_vm9, %v878_v5, %v879_v3  ;;  %v542_v7 = vsel %vm309_vm9, %v879_v3, %v878_v5 }
 0x31a   : > { %v887_v8 = vpop.permute.xlu0 %886  ;;  %v570_v10 = vsel %vm298_vm8, %v540_v6, %v560_v55  ;;  %v569_v12 = vsel %vm298_vm8, %v542_v7, %v559_v59 }
 0x31b   : > { %v889_v13 = vunpack.i.h.bf16 %v887_v8  ;;  %v888_v15 = vunpack.i.l.bf16 %v887_v8  ;;  %v815_v18 = vpack.c.bf16 %v570_v10, %v539_v9  ;;  %v817_v22 = vpack.c.bf16 %v569_v12, %v541_v11 }
 0x31d   : > { %816 = vmatprep.subr.bf16.mxu1 %v815_v18  ;;  %v553_v23 = vsel %vm322_vm10, %v889_v13, %v888_v15  ;;  %v551_v28 = vsel %vm322_vm10, %v888_v15, %v889_v13 }
 0x31e   : > { %818 = vmatpush1.bf16.msra.mxu1 %v817_v22  ;;  %v819_v29 = vpack.c.bf16 %v553_v23, %v564_v60  ;;  %v550_v30 = vpop.permute.xlu0 %549  ;;  %v821_v31 = vpack.c.bf16 %v551_v28, %v562_v61 }
 0x31f   : > { %v554_v27 = vsel %vm322_vm10, %v550_v30, %v546_v26  ;;  %v552_v33 = vsel %vm322_vm10, %v546_v26, %v550_v30 }
 0x320   : > { %820 = vmatprep.subr.bf16.mxu1 %v819_v29 }
 0x322   : > { %822 = vmatpush1.bf16.msra.mxu1 %v821_v31 }
 0x323   : > { %798 = vmatprep.subr.msk.mxu1 %vm298_vm8, %v554_v27 }
 0x326   : > { %799 = vmatpush1.msk.msra.mxu1 %vm298_vm8, %v552_v33 }
 0x327   : > { %800 = vmatmul.mubr.msk.f32.vlgmr.msra.gmra.mrb[0].mxu1 %vm348_vm11, %v254_v32  ;;  %v574_v24 = vpop.permute.xlu1 %573 }
 0x3fa   : > { %v651_v16 = vpop.f32.mrb[0].mxu1 }
 0x3fb   : > { %v652_v25 = vadd.f32 %v651_v16, %v574_v24  ;;  %v653_v19 = vpop.f32.mrb[1].mxu1 }
 0x3fc   : > { %v654_v34 = vadd.f32 %v653_v19, %v574_v24 }
 0x3fd   : > { %v656_v35 = vadd.f32 %v652_v25, %v963_v0 }
 0x3fe   : > { %v657_v36 = vadd.f32 %v654_v34, %v969_v1 }
 0x3ff   : > { %v660_v37 = vmul.f32 0.70710677, %v656_v35  ;;  %v658_v16 = vmul.f32 0.5, %v656_v35 }
 0x400   : > { %v661_v38 = vmul.f32 0.70710677, %v657_v36  ;;  %v659_v19 = vmul.f32 0.5, %v657_v36 }
 0x401   : > { %v801_v39 = vclamps-f32 %v660_v37, 4.0 }
 0x402   : > { %v802_v40 = vclamps-f32 %v661_v38, 4.0 }
 0x403   : > { %v666_v41 = vmul.f32 %v801_v39, %v801_v39 }
 0x404   : > { %v667_v4 = vmul.f32 %v802_v40, %v802_v40 }
 0x405   : > { %v684_v42 = vmul.f32 -1.1791603e-07, %v666_v41  ;;  %v668_v49 = vmul.f32 0.00022905065, %v666_v41 }
 0x406   : > { %v685_v43 = vmul.f32 -1.1791603e-07, %v667_v4  ;;  %v669_v52 = vmul.f32 0.00022905065, %v667_v4 }
 0x407   : > { %v686_v44 = vadd.f32 2.3547966e-05, %v684_v42  ;;  %v670_v1 = vadd.f32 0.003408291, %v668_v49 }
 0x408   : > { %v687_v45 = vadd.f32 2.3547966e-05, %v685_v43  ;;  %v671_v54 = vadd.f32 0.003408291, %v669_v52 }
 0x409   : > { %v688_v46 = vmul.f32 %v686_v44, %v666_v41  ;;  %v672_v57 = vmul.f32 %v670_v1, %v666_v41 }
 0x40a   : > { %v689_v47 = vmul.f32 %v687_v45, %v667_v4  ;;  %v673_v60 = vmul.f32 %v671_v54, %v667_v4 }
 0x40b   : > { %v690_v48 = vadd.f32 0.0010179626, %v688_v46  ;;  %v674_v21 = vadd.f32 0.050955694, %v672_v57 }
 0x40c   : > { %v691_v50 = vadd.f32 0.0010179626, %v689_v47  ;;  %v675_v2 = vadd.f32 0.050955694, %v673_v60 }
 0x40d   : > { %v692_v51 = vmul.f32 %v690_v48, %v666_v41  ;;  %v676_v6 = vmul.f32 %v674_v21, %v666_v41 }
 0x40e   : > { %v693_v0 = vmul.f32 %v691_v50, %v667_v4  ;;  %v677_v8 = vmul.f32 %v675_v2, %v667_v4 }
 0x40f   : > { %v694_v14 = vadd.f32 0.01407047, %v692_v51  ;;  %v678_v9 = vadd.f32 0.18520832, %v676_v6 }
 0x410   : > { %v695_v17 = vadd.f32 0.01407047, %v693_v0  ;;  %v679_v10 = vadd.f32 0.18520832, %v677_v8 }
 0x411   : > { %v696_v53 = vmul.f32 %v694_v14, %v666_v41  ;;  %v680_v11 = vmul.f32 %v678_v9, %v666_v41 }
 0x412   : > { %v697_v55 = vmul.f32 %v695_v17, %v667_v4  ;;  %v681_v12 = vmul.f32 %v679_v10, %v667_v4 }
 0x413   : > { %v698_v56 = vadd.f32 0.11098505, %v696_v53  ;;  %v682_v18 = vadd.f32 1.1283791, %v680_v11 }
 0x414   : > { %v699_v58 = vadd.f32 0.11098505, %v697_v55  ;;  %v683_v23 = vadd.f32 1.1283791, %v681_v12 }
 0x415   : > { %v700_v59 = vmul.f32 %v698_v56, %v666_v41  ;;  %v716_v26 = vmul.f32 %v801_v39, %v682_v18 }
 0x416   : > { %v701_v61 = vmul.f32 %v699_v58, %v667_v4  ;;  %v717_v32 = vmul.f32 %v802_v40, %v683_v23 }
 0x417   : > { %v702_v20 = vadd.f32 0.49746925, %v700_v59 }
 0x418   : > { %v703_v62 = vadd.f32 0.49746925, %v701_v61 }
 0x419   : > { %v704_v63 = vmul.f32 %v702_v20, %v666_v41 }
 0x41a   : > { %v705_v3 = vmul.f32 %v703_v62, %v667_v4 }
 0x41b   : > { %v706_v5 = vadd.f32 1.0, %v704_v63 }
 0x41c   : > { %v707_v7 = vadd.f32 1.0, %v705_v3 }
 0x41d   : > { %897 = vrcp.f32 %v706_v5 }
 0x41e   : > { %899 = vrcp.f32 %v707_v7 }
 0x427   : > { %v898_v13 = vpop.eup %897 }
 0x428   : > { %v900_v15 = vpop.eup %899  ;;  %v710_v22 = vmul.f32 %v898_v13, %v706_v5 }
 0x429   : > { %v711_v28 = vmul.f32 %v900_v15, %v707_v7 }
 0x42a   : > { %v712_v29 = vsub.f32 2.0, %v710_v22 }
 0x42b   : > { %v713_v30 = vsub.f32 2.0, %v711_v28 }
 0x42c   : > { %v714_v31 = vmul.f32 %v898_v13, %v712_v29 }
 0x42d   : > { %v715_v27 = vmul.f32 %v900_v15, %v713_v30 }
 0x42e   : > { %v718_v33 = vmul.f32 %v716_v26, %v714_v31 }
 0x42f   : > { %v719_v24 = vmul.f32 %v717_v32, %v715_v27 }
 0x430   : > { %v720_v25 = vadd.f32 1.0, %v718_v33 }
 0x431   : > { %v721_v34 = vadd.f32 1.0, %v719_v24 }
 0x432   : > { %v722_v37 = vmul.f32 %v720_v25, %v658_v16 }
 0x433   : > { %v723_v38 = vmul.f32 %v721_v34, %v659_v19 }
 0x435   : > { %v726_v41 = vcombine.low %v722_v37, %v723_v38 }
 0x437   : > { %728 = vst [vmem:[%s224_s15] sm:$0xff] %v726_v41 }
 0x438 PF: > { %s15_s18 = sadd.s32 1, %s907_s18  }
 0x439   : > { %p12_p4 = scmp.ge.s32.totalorder %s15_s18, 4  }
 0x43b   :  { %14 = sbr.rel (!%p12_p4) target bundleno = 1 (0x1), region = 70 }

</bundles_post_ra>
